<compile_context>
chip_gen: v6e
topology: v6e:2x2x1
jax: 0.10.0
libtpu: 0.0.40
codegen_flags: <defaults>
</compile_context>

<pallas_src>
import functools

import jax
import jax.numpy as jnp
from jax.experimental import pallas as pl
from jax.experimental.pallas import tpu as pltpu

LANE = 128            # TPU lane width: hidden/output features padded to this
SUBLANE = 8           # f32 sublane height: batch tiles are multiples of this
BATCH_TILE_CAP = 1024 # rows per grid step (512-1024 ~ 85% of HBM roofline)
MIN_PALLAS_BATCH = 128  # below this, plain XLA fusion beats a kernel launch


def _round_up(n, m):
    return ((n + m - 1) // m) * m


def mlp_kernel(x_ref, w1_ref, w_ref, b_ref, o_ref):
    """Fused 4-layer MLP for one batch tile.

    x_ref : (block_b, in_size) f32  -- cast to bf16 in-kernel (VPU slack)
    w1_ref: (in_size, P)       bf16
    w_ref : (3, P, P)          bf16 -- fc2, fc3, fc4 stacked
    b_ref : (4, P)             f32  -- all biases stacked
    o_ref : (block_b, P)            -- lane-dense output slab

    Dots run as bf16 MXU ops with f32 accumulation; bias adds / ReLUs stay f32
    (v5e's VPU has no bf16 arithmetic)."""
    x = x_ref[...].astype(w1_ref.dtype)                       # f32 -> bf16

    h = jnp.dot(x, w1_ref[...],
                preferred_element_type=jnp.float32) + b_ref[0:1, :]
    h = jnp.maximum(h, 0.0)

    h = jnp.dot(h.astype(w_ref.dtype), w_ref[0],
                preferred_element_type=jnp.float32) + b_ref[1:2, :]
    h = jnp.maximum(h, 0.0)

    h = jnp.dot(h.astype(w_ref.dtype), w_ref[1],
                preferred_element_type=jnp.float32) + b_ref[2:3, :]
    h = jnp.maximum(h, 0.0)

    out = jnp.dot(h.astype(w_ref.dtype), w_ref[2],
                  preferred_element_type=jnp.float32) + b_ref[3:4, :]
    o_ref[...] = out.astype(o_ref.dtype)          # unmasked full-width store


@functools.partial(jax.jit,
                   static_argnames=("block_b", "force_pallas", "out_dtype"))
def neural_net_fiedler_forward(x, params, *, block_b=None, force_pallas=False,
                               out_dtype=jnp.float32):
    """params = (w1, b1, w2, b2, w3, b3, w4, b4); wN are (in, out), bN (1, out)."""
    w1, b1, w2, b2, w3, b3, w4, b4 = params
    B, in_size = x.shape
    hidden = w1.shape[1]
    num_classes = w4.shape[1]

    # Tiny-batch fast path: kernel launch + pad passes dwarf the actual work
    # below ~128 rows; plain XLA fusion wins there on every TPU generation.
    if not force_pallas and B < MIN_PALLAS_BATCH:
        h = jnp.maximum(x @ w1 + b1, 0.0)
        h = jnp.maximum(h @ w2 + b2, 0.0)
        h = jnp.maximum(h @ w3 + b3, 0.0)
        return (h @ w4 + b4).astype(out_dtype)

    # One padded lane width P for all hidden/output features: full vregs and a
    # lane-dense output (unmasked vst). Zero padding propagates exactly through
    # matmul + bias(0) + ReLU. x's feature dim is NOT padded (it is the only
    # B-scaled input; padding 32 -> 128 would 4x its HBM read traffic).
    P = _round_up(max(hidden, num_classes), LANE)

    # Batch tile: as big as reasonable (per-step overhead ~0.35us), capped at
    # BATCH_TILE_CAP; for batches above the cap keep >= 2 grid steps so v7x's
    # two TensorCores both get work via dimension_semantics=("parallel",).
    B8 = _round_up(B, SUBLANE)
    if block_b is None:
        if B8 <= BATCH_TILE_CAP:
            block_b = B8
        else:
            block_b = min(BATCH_TILE_CAP,
                          _round_up(pl.cdiv(B8, 2), SUBLANE))
    block_b = _round_up(block_b, SUBLANE)
    B_p = _round_up(B, block_b)

    def pad2(a, rows, cols):
        if a.shape == (rows, cols):
            return a
        return jnp.pad(a, ((0, rows - a.shape[0]), (0, cols - a.shape[1])))

    # x stays f32 in HBM (bf16 cast happens in-kernel); only the batch dim is
    # padded, and only when needed. Padded rows produce ReLU(bias) junk that is
    # sliced off below -- do not remove that row slice without masking instead.
    xp = pad2(x, B_p, in_size)

    # Tiny resident params: bf16 weights (fast MXU path, half the DMA bytes),
    # f32 biases. Stacked to cut operand count 9 -> 4.
    w1p = pad2(w1, in_size, P).astype(jnp.bfloat16)
    w_stack = jnp.stack([pad2(w2, P, P),
                         pad2(w3, P, P),
                         pad2(w4, P, P)]).astype(jnp.bfloat16)
    b_stack = jnp.concatenate([pad2(b1, 1, P), pad2(b2, 1, P),
                               pad2(b3, 1, P), pad2(b4, 1, P)],
                              axis=0).astype(jnp.float32)

    grid = (B_p // block_b,)

    def resident_spec(shape):
        # Whole (small) parameter lives in VMEM; constant index_map means the
        # same block every grid step, Buffered(1) drops the wasted second
        # pipeline buffer for these resident operands.
        nd = len(shape)
        return pl.BlockSpec(shape, lambda i, _nd=nd: (0,) * _nd,
                            pipeline_mode=pl.Buffered(buffer_count=1))

    out = pl.pallas_call(
        mlp_kernel,
        out_shape=jax.ShapeDtypeStruct((B_p, P), out_dtype),
        grid_spec=pltpu.PrefetchScalarGridSpec(
            num_scalar_prefetch=0,
            grid=grid,
            in_specs=[
                pl.BlockSpec((block_b, in_size), lambda i: (i, 0)),  # x tile
                resident_spec(w1p.shape),
                resident_spec(w_stack.shape),
                resident_spec(b_stack.shape),
            ],
            out_specs=pl.BlockSpec((block_b, P), lambda i: (i, 0)),
        ),
        compiler_params=pltpu.CompilerParams(
            dimension_semantics=("parallel",),
            # safe on v5e/v6e (128 MiB) and v7x (64 MiB); actual use is a few MiB
            vmem_limit_bytes=32 * 1024 * 1024,
        ),
    )(xp, w1p, w_stack, b_stack)

    # Slice only what was actually padded (avoid an extra full copy otherwise).
    if B_p != B:
        out = out[:B]
    if P != num_classes:
        out = out[:, :num_classes]
    return out


def init_params(key, input_size, hidden_size, num_classes):
    """Deterministic init mimicking nn.Linear default (uniform +/- 1/sqrt(fan_in)).
    Weights returned pre-transposed to (in, out); biases as (1, out)."""
    dims = [(input_size, hidden_size),
            (hidden_size, hidden_size),
            (hidden_size, hidden_size),
            (hidden_size, num_classes)]
    params = []
    for (fan_in, fan_out) in dims:
        key, kw, kb = jax.random.split(key, 3)
        bound = 1.0 / (fan_in ** 0.5)
        w = jax.random.uniform(kw, (fan_in, fan_out), jnp.float32, -bound, bound)
        b = jax.random.uniform(kb, (1, fan_out), jnp.float32, -bound, bound)
        params.extend([w, b])
    return tuple(params)


def reference_forward_f32(x, params):
    """Pure-f32 reference (module semantics)."""
    w1, b1, w2, b2, w3, b3, w4, b4 = params
    h = jnp.maximum(x @ w1 + b1, 0.0)
    h = jnp.maximum(h @ w2 + b2, 0.0)
    h = jnp.maximum(h @ w3 + b3, 0.0)
    return h @ w4 + b4


def reference_forward_bf16(x, params):
    """Reference with the same bf16-operand / f32-accumulate arithmetic as the kernel."""
    w1, b1, w2, b2, w3, b3, w4, b4 = params
    bf = jnp.bfloat16

    def lin(a, w, b):
        return jnp.dot(a.astype(bf), w.astype(bf),
                       preferred_element_type=jnp.float32) + b

    h = jnp.maximum(lin(x, w1, b1), 0.0)
    h = jnp.maximum(lin(h, w2, b2), 0.0)
    h = jnp.maximum(lin(h, w3, b3), 0.0)
    return lin(h, w4, b4)


if __name__ == "__main__":
    input_size, hidden_size, num_classes = 32, 32, 10
    batch = 16

    key = jax.random.PRNGKey(0)
    key, kx = jax.random.split(key)
    x = jax.random.normal(kx, (batch, input_size), jnp.float32)
    params = init_params(key, input_size, hidden_size, num_classes)

    # 1) Pallas path, single grid step (force past the tiny-batch fast path).
    out = neural_net_fiedler_forward(x, params, force_pallas=True)
    out = jax.block_until_ready(out)
    assert out.shape == (batch, num_classes)

    ref_bf = reference_forward_bf16(x, params)
    assert jnp.allclose(out, ref_bf, atol=2e-3, rtol=2e-3), "mismatch vs bf16 reference"
    ref_f32 = reference_forward_f32(x, params)
    assert jnp.allclose(out, ref_f32, atol=5e-2, rtol=5e-2), "mismatch vs f32 reference"

    # 2) Pallas path with a multi-step grid and padded batch rows (B=40,
    #    block_b=16 -> grid=(3,), 8 junk rows sliced off).
    key, kx2 = jax.random.split(key)
    x2 = jax.random.normal(kx2, (40, input_size), jnp.float32)
    out2 = neural_net_fiedler_forward(x2, params, block_b=16, force_pallas=True)
    out2 = jax.block_until_ready(out2)
    assert out2.shape == (40, num_classes)
    assert jnp.allclose(out2, reference_forward_bf16(x2, params),
                        atol=2e-3, rtol=2e-3), "mismatch vs bf16 reference (grid=3)"

    # 3) Tiny-batch fast path (no pallas_call) matches the f32 module exactly.
    out_fast = jax.block_until_ready(neural_net_fiedler_forward(x, params))
    assert jnp.allclose(out_fast, ref_f32, atol=1e-5, rtol=1e-5), "fast path mismatch"

    # TODO(synk): setLaplacian / getLaplacian / getFiedlerVec (sparse Laplacian
    # eigensolve) are graph-analysis utilities outside the forward pass; no
    # Pallas equivalent implemented.
    print("KERNEL_OK")
</pallas_src>

<mosaic_0001>
module attributes {stable_mosaic.version = 11 : i64} {
  func.func @mlp_kernel(%arg0: i32, %arg1: memref<16x32xf32, #tpu.memory_space<vmem>>, %arg2: memref<32x128xbf16, #tpu.memory_space<vmem>>, %arg3: memref<3x128x128xbf16, #tpu.memory_space<vmem>>, %arg4: memref<4x128xf32, #tpu.memory_space<vmem>>, %arg5: memref<16x128xf32, #tpu.memory_space<vmem>>) attributes {dimension_semantics = [#tpu.dimension_semantics<parallel>], iteration_bounds = array<i64: 1>, scalar_prefetch = 0 : i64, scratch_operands = 0 : i64, tpu.core_type = #tpu.core_type<tc>, window_params = [{transform_indices = @transform_0, window_bounds = array<i64: 16, 32>}, {pipeline_mode = #tpu.pipeline_mode<synchronous>, transform_indices = @transform_1, window_bounds = array<i64: 32, 128>}, {pipeline_mode = #tpu.pipeline_mode<synchronous>, transform_indices = @transform_2, window_bounds = array<i64: 3, 128, 128>}, {pipeline_mode = #tpu.pipeline_mode<synchronous>, transform_indices = @transform_3, window_bounds = array<i64: 4, 128>}, {transform_indices = @transform_4, window_bounds = array<i64: 16, 128>}]} {
    %c0 = arith.constant 0 : index
    %c0_0 = arith.constant 0 : index
    %0 = vector.load %arg1[%c0, %c0_0] : memref<16x32xf32, #tpu.memory_space<vmem>>, vector<16x32xf32>
    %1 = arith.truncf %0 : vector<16x32xf32> to vector<16x32xbf16>
    %c0_1 = arith.constant 0 : index
    %c0_2 = arith.constant 0 : index
    %2 = vector.load %arg2[%c0_1, %c0_2] : memref<32x128xbf16, #tpu.memory_space<vmem>>, vector<32x128xbf16>
    %cst = arith.constant dense<0.000000e+00> : vector<16x128xf32>
    %3 = tpu.matmul %1, %2, %cst {dimension_numbers = #tpu.dot_dimension_numbers<[1], [0], [0], [1], [0, 0, 1, 1], [], []>} : vector<16x32xbf16>, vector<32x128xbf16>, vector<16x128xf32> -> vector<16x128xf32>
    %c0_3 = arith.constant 0 : index
    %c0_4 = arith.constant 0 : index
    %4 = vector.load %arg4[%c0_3, %c0_4] : memref<4x128xf32, #tpu.memory_space<vmem>>, vector<1x128xf32>
    %5 = vector.broadcast %4 : vector<1x128xf32> to vector<16x128xf32>
    %6 = arith.addf %3, %5 : vector<16x128xf32>
    %cst_5 = arith.constant 0.000000e+00 : f32
    %7 = vector.broadcast %cst_5 : f32 to vector<16x128xf32>
    %8 = arith.maximumf %6, %7 : vector<16x128xf32>
    %9 = arith.truncf %8 : vector<16x128xf32> to vector<16x128xbf16>
    %c0_6 = arith.constant 0 : index
    %c0_7 = arith.constant 0 : index
    %c0_8 = arith.constant 0 : index
    %10 = vector.load %arg3[%c0_6, %c0_7, %c0_8] : memref<3x128x128xbf16, #tpu.memory_space<vmem>>, vector<1x128x128xbf16>
    %11 = vector.shape_cast %10 : vector<1x128x128xbf16> to vector<128x128xbf16>
    %cst_9 = arith.constant dense<0.000000e+00> : vector<16x128xf32>
    %12 = tpu.matmul %9, %11, %cst_9 {dimension_numbers = #tpu.dot_dimension_numbers<[1], [0], [0], [1], [0, 0, 1, 1], [], []>} : vector<16x128xbf16>, vector<128x128xbf16>, vector<16x128xf32> -> vector<16x128xf32>
    %c1 = arith.constant 1 : index
    %c0_10 = arith.constant 0 : index
    %13 = vector.load %arg4[%c1, %c0_10] : memref<4x128xf32, #tpu.memory_space<vmem>>, vector<1x128xf32>
    %14 = vector.broadcast %13 : vector<1x128xf32> to vector<16x128xf32>
    %15 = arith.addf %12, %14 : vector<16x128xf32>
    %cst_11 = arith.constant 0.000000e+00 : f32
    %16 = vector.broadcast %cst_11 : f32 to vector<16x128xf32>
    %17 = arith.maximumf %15, %16 : vector<16x128xf32>
    %18 = arith.truncf %17 : vector<16x128xf32> to vector<16x128xbf16>
    %c1_12 = arith.constant 1 : index
    %c0_13 = arith.constant 0 : index
    %c0_14 = arith.constant 0 : index
    %19 = vector.load %arg3[%c1_12, %c0_13, %c0_14] : memref<3x128x128xbf16, #tpu.memory_space<vmem>>, vector<1x128x128xbf16>
    %20 = vector.shape_cast %19 : vector<1x128x128xbf16> to vector<128x128xbf16>
    %cst_15 = arith.constant dense<0.000000e+00> : vector<16x128xf32>
    %21 = tpu.matmul %18, %20, %cst_15 {dimension_numbers = #tpu.dot_dimension_numbers<[1], [0], [0], [1], [0, 0, 1, 1], [], []>} : vector<16x128xbf16>, vector<128x128xbf16>, vector<16x128xf32> -> vector<16x128xf32>
    %c2 = arith.constant 2 : index
    %c0_16 = arith.constant 0 : index
    %22 = vector.load %arg4[%c2, %c0_16] : memref<4x128xf32, #tpu.memory_space<vmem>>, vector<1x128xf32>
    %23 = vector.broadcast %22 : vector<1x128xf32> to vector<16x128xf32>
    %24 = arith.addf %21, %23 : vector<16x128xf32>
    %cst_17 = arith.constant 0.000000e+00 : f32
    %25 = vector.broadcast %cst_17 : f32 to vector<16x128xf32>
    %26 = arith.maximumf %24, %25 : vector<16x128xf32>
    %27 = arith.truncf %26 : vector<16x128xf32> to vector<16x128xbf16>
    %c2_18 = arith.constant 2 : index
    %c0_19 = arith.constant 0 : index
    %c0_20 = arith.constant 0 : index
    %28 = vector.load %arg3[%c2_18, %c0_19, %c0_20] : memref<3x128x128xbf16, #tpu.memory_space<vmem>>, vector<1x128x128xbf16>
    %29 = vector.shape_cast %28 : vector<1x128x128xbf16> to vector<128x128xbf16>
    %cst_21 = arith.constant dense<0.000000e+00> : vector<16x128xf32>
    %30 = tpu.matmul %27, %29, %cst_21 {dimension_numbers = #tpu.dot_dimension_numbers<[1], [0], [0], [1], [0, 0, 1, 1], [], []>} : vector<16x128xbf16>, vector<128x128xbf16>, vector<16x128xf32> -> vector<16x128xf32>
    %c3 = arith.constant 3 : index
    %c0_22 = arith.constant 0 : index
    %31 = vector.load %arg4[%c3, %c0_22] : memref<4x128xf32, #tpu.memory_space<vmem>>, vector<1x128xf32>
    %32 = vector.broadcast %31 : vector<1x128xf32> to vector<16x128xf32>
    %33 = arith.addf %30, %32 : vector<16x128xf32>
    %c0_23 = arith.constant 0 : index
    %c0_24 = arith.constant 0 : index
    %34 = vector.load %arg5[%c0_23, %c0_24] : memref<16x128xf32, #tpu.memory_space<vmem>>, vector<16x128xf32>
    tpu.vector_store %arg5[%c0_23, %c0_24], %33 {strides = array<i32>} : memref<16x128xf32, #tpu.memory_space<vmem>>, vector<16x128xf32>,
    return
  }
  func.func @transform_0(%arg0: i32) -> (i32, i32) {
    %c0_i32 = arith.constant 0 : i32
    %c0_i32_0 = arith.constant 0 : i32
    return %arg0, %c0_i32 : i32, i32
  }
  func.func @transform_1(%arg0: i32) -> (i32, i32) {
    %c0_i32 = arith.constant 0 : i32
    %c0_i32_0 = arith.constant 0 : i32
    %c0_i32_1 = arith.constant 0 : i32
    return %c0_i32, %c0_i32_0 : i32, i32
  }
  func.func @transform_2(%arg0: i32) -> (i32, i32, i32) {
    %c0_i32 = arith.constant 0 : i32
    %c0_i32_0 = arith.constant 0 : i32
    %c0_i32_1 = arith.constant 0 : i32
    %c0_i32_2 = arith.constant 0 : i32
    return %c0_i32, %c0_i32_0, %c0_i32_1 : i32, i32, i32
  }
  func.func @transform_3(%arg0: i32) -> (i32, i32) {
    %c0_i32 = arith.constant 0 : i32
    %c0_i32_0 = arith.constant 0 : i32
    %c0_i32_1 = arith.constant 0 : i32
    return %c0_i32, %c0_i32_0 : i32, i32
  }
  func.func @transform_4(%arg0: i32) -> (i32, i32) {
    %c0_i32 = arith.constant 0 : i32
    %c0_i32_0 = arith.constant 0 : i32
    return %arg0, %c0_i32 : i32, i32
  }
}

</mosaic_0001>

<bundles_post_ra>
// kernel: neural_net_fiedler_forward.1
= control target key start
LH: loop header
LB: loop body
LE: loop exit
PB: predicated region body
PF: predicated region fallthrough
CT: control target
= control target key end

     0   :  { %v661_v1 = vmov 0.0   ;;  %vm662_vm0 = vmmov 0   ;;  %vm43_vm1 = vcmask 261120   ;;  %s824_s0 = inlined_call_operand.vmem [shape: f32[16,32], index: 0, kind: input, shape index: {}]   ;;  %s825_s1 = inlined_call_operand.vmem [shape: bf16[32,128], index: 1, kind: input, shape index: {}]   ;;  %s826_s2 = inlined_call_operand.vmem [shape: bf16[3,128,128], index: 2, kind: input, shape index: {}]   ;;  %s827_s3 = inlined_call_operand.vmem [shape: f32[4,128], index: 3, kind: input, shape index: {}]   ;;  %s828_s4 = inlined_call_operand.hbm [shape: f32[16,128], index: 4, kind: output, shape index: {}]  }
   0x1   :  { %v613_v0 = vld [vmem:[%s825_s1 + $0x8] sm:$0xff]   ;;  %540 = vmatprep.subr.bf16.mxu0 %v661_v1  ;;  %v614_v2 = vld [vmem:[%s825_s1] sm:$0xff]   ;;  %548 = vmatprep.subr.bf16.mxu1 %v661_v1  ;;  %v615_v5 = vld [vmem:[%s826_s2 + $0x38] sm:$0xff]  }
   0x2   :  { %541 = vmatpush3.bf16.msra.mxu0 %v613_v0  ;;  %544 = vmatprep.mubr.msk.bf16.mxu0 %vm662_vm0, %v661_v1  ;;  %v19_v3 = vld [vmem:[%s824_s0] sm:$0xff]  ;;  %v20_v4 = vld [vmem:[%s824_s0 + $0x8] sm:$0xff]  ;;  %v616_v7 = vld [vmem:[%s826_s2 + $0x30] sm:$0xff]  }
   0x3   :  { %542 = vmatprep.subr.bf16.mxu0 %v661_v1  ;;  %564 = vmatprep.mubr.msk.bf16.mxu1 %vm662_vm0, %v661_v1  ;;  %v21_v6 = vpack.c.bf16 %v20_v4, %v19_v3  ;;  %v617_v8 = vld [vmem:[%s826_s2 + $0x28] sm:$0xff]   ;;  %v618_v9 = vld [vmem:[%s826_s2 + $0x20] sm:$0xff]   ;;  %v619_v10 = vld [vmem:[%s826_s2 + $0x18] sm:$0xff]  }
   0x4   :  { %549 = vmatpush3.bf16.msra.mxu1 %v615_v5 }
   0x5   :  { %550 = vmatprep.subr.bf16.mxu1 %v661_v1 }
   0x6   :  { %543 = vmatpush3.bf16.msra.mxu0 %v614_v2 }
   0x7   :  { %568 = vmatprep.subr.bf16.mxu0 %v661_v1 }
   0x8   :  { %551 = vmatpush3.bf16.msra.mxu1 %v616_v7 }
   0x9   :  { %545 = vmatmul.mubr.msk.bf16.vlgmr.msra.gmra.mxu0 %vm43_vm1, %v21_v6  ;;  %552 = vmatprep.subr.bf16.mxu1 %v661_v1 }
   0xa   :  { %584 = vmatprep.mubr.msk.bf16.mxu0 %vm662_vm0, %v661_v1 }
   0xc   :  { %553 = vmatpush3.bf16.msra.mxu1 %v617_v8 }
   0xd   :  { %554 = vmatprep.subr.bf16.mxu1 %v661_v1 }
  0x10   :  { %555 = vmatpush3.bf16.msra.mxu1 %v618_v9 }
  0x11   :  { %556 = vmatprep.subr.bf16.mxu1 %v661_v1 }
  0x12   :  { %9 = vsyncpa [#allocation3], 0  ;;  %v620_v11 = vld [vmem:[%s826_s2 + $0x10] sm:$0xff]   ;;  %v621_v12 = vld [vmem:[%s826_s2 + $0x8] sm:$0xff]  }
  0x13   :  { %v622_v13 = vld [vmem:[%s826_s2] sm:$0xff]   ;;  %v623_v14 = vld [vmem:[%s826_s2 + $0x78] sm:$0xff]   ;;  %v624_v15 = vld [vmem:[%s826_s2 + $0x70] sm:$0xff]  }
  0x14   :  { %557 = vmatpush3.bf16.msra.mxu1 %v619_v10  ;;  %569 = vmatpush3.bf16.msra.mxu0 %v623_v14  ;;  %v625_v16 = vld [vmem:[%s826_s2 + $0x68] sm:$0xff]   ;;  %v626_v17 = vld [vmem:[%s826_s2 + $0x60] sm:$0xff]   ;;  %v627_v18 = vld [vmem:[%s826_s2 + $0x58] sm:$0xff]  }
  0x15   :  { %558 = vmatprep.subr.bf16.mxu1 %v661_v1  ;;  %570 = vmatprep.subr.bf16.mxu0 %v661_v1  ;;  %v447_v19 = vld [vmem:[%s827_s3] ss:$0 sm:$0xff]  ;;  %v628_v29 = vld [vmem:[%s826_s2 + $0x50] sm:$0xff]   ;;  %v629_v30 = vld [vmem:[%s826_s2 + $0x48] sm:$0xff]  }
  0x16   :  { %v630_v31 = vld [vmem:[%s826_s2 + $0x40] sm:$0xff]   ;;  %v631_v32 = vld [vmem:[%s826_s2 + $0xb8] sm:$0xff]   ;;  %v632_v33 = vld [vmem:[%s826_s2 + $0xb0] sm:$0xff]  }
  0x17   :  { %v633_v34 = vld [vmem:[%s826_s2 + $0xa8] sm:$0xff]   ;;  %v634_v35 = vld [vmem:[%s826_s2 + $0xa0] sm:$0xff]   ;;  %v635_v36 = vld [vmem:[%s826_s2 + $0x98] sm:$0xff]  }
  0x18   :  { %559 = vmatpush3.bf16.msra.mxu1 %v620_v11  ;;  %571 = vmatpush3.bf16.msra.mxu0 %v624_v15  ;;  %v451_v37 = vld [vmem:[%s827_s3 + $0x1] ss:$0 sm:$0xff]  ;;  %v636_v47 = vld [vmem:[%s826_s2 + $0x90] sm:$0xff]   ;;  %v637_v48 = vld [vmem:[%s826_s2 + $0x88] sm:$0xff]  }
  0x19   :  { %560 = vmatprep.subr.bf16.mxu1 %v661_v1  ;;  %572 = vmatprep.subr.bf16.mxu0 %v661_v1  ;;  %v638_v49 = vld [vmem:[%s826_s2 + $0x80] sm:$0xff]   ;;  %s663_s2 = smov [#allocation2]  }
  0x1a   :  { %v476_v50 = vld [vmem:[%s827_s3 + $0x2] ss:$0 sm:$0xff]  ;;  %v501_v60 = vld [vmem:[%s827_s3 + $0x3] ss:$0 sm:$0xff]  ;;  %s436_s23 = sshll.u32 %s663_s2, 4  ;;  %s437_s23 = int_to_ptr.vmem [resolvable:$true] %s436_s23 }
  0x1b   :  { %s639_s24 = scalar_lea.vmem %s437_s23, 256  ;;  %p644_p1 = scmp.lt.s32.totalorder %s437_s23, %s437_s23 }
  0x1c   :  { %561 = vmatpush3.bf16.msra.mxu1 %v621_v12  ;;  %573 = vmatpush3.bf16.msra.mxu0 %v625_v16  ;;  %p640_p0 = scmp.ne.s32.totalorder %s437_s23, %s639_s24  ;;  %p645_p2 = scmp.lt.s32.totalorder %s639_s24, %s639_s24 }
  0x1d   :  { %562 = vmatprep.subr.bf16.mxu1 %v661_v1  ;;  %574 = vmatprep.subr.bf16.mxu0 %v661_v1 }
  0x1e   :  { %p646_p3 = por %p645_p2, %p644_p1 }
  0x20   :  { %563 = vmatpush3.bf16.msra.mxu1 %v622_v13  ;;  %575 = vmatpush3.bf16.msra.mxu0 %v626_v17  ;;  %p647_p4 = pnand %p646_p3, %p640_p0 }
  0x21   :  { %588 = vmatprep.subr.bf16.mxu1 %v661_v1  ;;  %576 = vmatprep.subr.bf16.mxu0 %v661_v1 }
  0x24   :  { %577 = vmatpush3.bf16.msra.mxu0 %v627_v18 }
  0x25   :  { %578 = vmatprep.subr.bf16.mxu0 %v661_v1 }
  0x28   :  { %579 = vmatpush3.bf16.msra.mxu0 %v628_v29 }
  0x29   :  { %580 = vmatprep.subr.bf16.mxu0 %v661_v1 }
  0x2c   :  { %581 = vmatpush3.bf16.msra.mxu0 %v629_v30 }
  0x2d   :  { %582 = vmatprep.subr.bf16.mxu0 %v661_v1 }
  0x30   :  { %583 = vmatpush3.bf16.msra.mxu0 %v630_v31 }
  0xc9   :  { %v81_v20 = vpop.f32.mrf.mxu0 }
  0xca   :  { %v82_v22 = vadd.f32 %v447_v19, %v81_v20 }
  0xcb   :  { %v546_v21 = vpop.f32.mrf.mxu0 }
  0xcc   :  { %v88_v26 = vmax.f32 %v82_v22, 0.0 }
  0xcd   :  { %v84_v23 = vpop.f32.mrf.mxu0 }
  0xce   :  { %v85_v24 = vadd.f32 %v447_v19, %v84_v23 }
  0xcf   :  { %v547_v25 = vpop.f32.mrf.mxu0 }
  0xd0   :  { %v89_v27 = vmax.f32 %v85_v24, 0.0 }
  0xd2   :  { %v90_v28 = vpack.c.bf16 %v89_v27, %v88_v26 }
  0xd4   :  { %565 = vmatmul.mubr.bf16.vlgmr.msra.gmra.mxu1 %v90_v28 }
  0xd5   :  { %604 = vmatprep.mubr.msk.bf16.mxu1 %vm662_vm0, %v661_v1  ;;  %589 = vmatpush3.bf16.msra.mxu1 %v631_v32 }
  0xd6   :  { %590 = vmatprep.subr.bf16.mxu1 %v661_v1 }
  0xd9   :  { %591 = vmatpush3.bf16.msra.mxu1 %v632_v33 }
  0xda   :  { %592 = vmatprep.subr.bf16.mxu1 %v661_v1 }
  0xdd   :  { %593 = vmatpush3.bf16.msra.mxu1 %v633_v34 }
  0xde   :  { %594 = vmatprep.subr.bf16.mxu1 %v661_v1 }
  0xe1   :  { %595 = vmatpush3.bf16.msra.mxu1 %v634_v35 }
  0xe2   :  { %596 = vmatprep.subr.bf16.mxu1 %v661_v1 }
  0xe5   :  { %597 = vmatpush3.bf16.msra.mxu1 %v635_v36 }
  0xe6   :  { %598 = vmatprep.subr.bf16.mxu1 %v661_v1 }
  0xe9   :  { %599 = vmatpush3.bf16.msra.mxu1 %v636_v47 }
  0xea   :  { %600 = vmatprep.subr.bf16.mxu1 %v661_v1 }
  0xed   :  { %601 = vmatpush3.bf16.msra.mxu1 %v637_v48 }
  0xee   :  { %602 = vmatprep.subr.bf16.mxu1 %v661_v1 }
  0xf1   :  { %603 = vmatpush3.bf16.msra.mxu1 %v638_v49 }
 0x194   :  { %v194_v38 = vpop.f32.mrf.mxu1 }
 0x195   :  { %v195_v40 = vadd.f32 %v451_v37, %v194_v38 }
 0x196   :  { %v566_v39 = vpop.f32.mrf.mxu1 }
 0x197   :  { %v201_v44 = vmax.f32 %v195_v40, 0.0 }
 0x198   :  { %v197_v41 = vpop.f32.mrf.mxu1 }
 0x199   :  { %v198_v42 = vadd.f32 %v451_v37, %v197_v41 }
 0x19a   :  { %v567_v43 = vpop.f32.mrf.mxu1 }
 0x19b   :  { %v202_v45 = vmax.f32 %v198_v42, 0.0 }
 0x19d   :  { %v203_v46 = vpack.c.bf16 %v202_v45, %v201_v44 }
 0x19f   :  { %585 = vmatmul.mubr.bf16.vlgmr.msra.gmra.mxu0 %v203_v46 }
 0x25f   :  { %v308_v51 = vpop.f32.mrf.mxu0 }
 0x260   :  { %v309_v53 = vadd.f32 %v476_v50, %v308_v51 }
 0x261   :  { %v586_v52 = vpop.f32.mrf.mxu0 }
 0x262   :  { %v315_v57 = vmax.f32 %v309_v53, 0.0 }
 0x263   :  { %v311_v54 = vpop.f32.mrf.mxu0 }
 0x264   :  { %v312_v55 = vadd.f32 %v476_v50, %v311_v54 }
 0x265   :  { %v587_v56 = vpop.f32.mrf.mxu0 }
 0x266   :  { %v316_v58 = vmax.f32 %v312_v55, 0.0 }
 0x268   :  { %v317_v59 = vpack.c.bf16 %v316_v58, %v315_v57 }
 0x26a   :  { %605 = vmatmul.mubr.bf16.vlgmr.msra.gmra.mxu1 %v317_v59 }
 0x32a   :  { %v422_v61 = vpop.f32.mrf.mxu1 }
 0x32b   :  { %v423_v62 = vadd.f32 %v501_v60, %v422_v61 }
 0x32c   :  { %v606_v63 = vpop.f32.mrf.mxu1 }
 0x32d   :  { %429 = vst [vmem:[#allocation2] sm:$0xff] %v423_v62 }
 0x32e   :  { %v425_v0 = vpop.f32.mrf.mxu1 }
 0x32f   :  { %v426_v1 = vadd.f32 %v501_v60, %v425_v0 }
 0x330   :  { %v607_v2 = vpop.f32.mrf.mxu1 }
 0x331   :  { %430 = vst [vmem:[#allocation2 + $0x8] sm:$0xff] %v426_v1 }
 0x332   :  { %650 = shalt.err (!%p647_p4)
}
 0x333   :  { %s664_s1 = smov 128   ;;  %s665_s3 = smov 8  }
 0x334   :  { %442 = dma.vmem_to_hbm [thread:$0]  %s437_s23, 256, %s828_s4, [#allocation3], %s664_s1, %s664_s1, %s665_s3  }
 0x335   :  { %659 = dma.done.wait [#allocation3], 256  }
 0x336   :  { %660 = vsyncadd [#allocation3], 4294967040 }
 0x337   :  { %446 = vsyncpa [#allocation3], 1 }

</bundles_post_ra>
